<compile_context>
chip_gen: v7x
topology: tpu7x:2x2x1
jax: 0.10.0
libtpu: 0.0.40
codegen_flags: <defaults>
</compile_context>

<pallas_src>
import functools

import jax
import jax.numpy as jnp
from jax import lax
from jax.experimental import pallas as pl
from jax.experimental.pallas import tpu as pltpu

BN_EPS = 1e-5
_SUBLANE = 8
S_BLK = 16              # steps folded into one grid block (vreg-pressure sweet spot)
OUT_SCALE = 1.0 / 32.0  # folded into the packed head params


def _align(n, a=_SUBLANE):
    return (n + a - 1) // a * a


def build_plan(layer_sizes):
    """Static packing + compute plan (all offsets are Python ints, baked into the kernel)."""
    num_layers = len(layer_sizes) - 1
    f_max = max(layer_sizes)
    plan = []
    row = 0
    for i in range(num_layers):
        fan_in, fan_out = layer_sizes[i], layer_sizes[i + 1]
        is_hidden = i < num_layers - 1
        if (not is_hidden) and fan_out == 1:
            mode, w_rows = "reduce", 1          # scalar head: (1,fi) . x^T -> lane-dense row
        elif fan_in <= _SUBLANE:
            mode, w_rows = "fma", fan_in        # tiny K: VPU broadcast FMAs, skip MXU
        else:
            mode, w_rows = "mxu", fan_in        # regular MXU matmul
        w_off = _align(row)                     # keep weight blocks sublane-aligned
        row = w_off + w_rows
        entry = dict(mode=mode, fan_in=fan_in, fan_out=fan_out,
                     w_off=w_off, b_off=row, is_hidden=is_hidden)
        row += 1
        if is_hidden:
            entry["g_off"] = row
            entry["beta_off"] = row + 1
            row += 2
        plan.append(entry)
    return plan, row, f_max


def init_params(key, layer_sizes):
    """nn.Linear default init U(-k, k), k = 1/sqrt(fan_in); BN gamma=1, beta=0."""
    params = []
    num_layers = len(layer_sizes) - 1
    for i in range(num_layers):
        fan_in, fan_out = layer_sizes[i], layer_sizes[i + 1]
        key, kw, kb = jax.random.split(key, 3)
        bound = float(fan_in) ** -0.5
        params.append(jax.random.uniform(kw, (fan_in, fan_out), jnp.float32, -bound, bound))
        params.append(jax.random.uniform(kb, (fan_out,), jnp.float32, -bound, bound))
        if i < num_layers - 1:
            params.append(jnp.ones((fan_out,), jnp.float32))   # gamma
            params.append(jnp.zeros((fan_out,), jnp.float32))  # beta
    return params


def pack_params(params, layer_sizes):
    """Pack all weights / biases / BN params into one (rows, F_max) f32 buffer => single DMA.

    The final /32 output scale is folded into the head weight and bias here (host-side,
    one-off, genuinely free)."""
    plan, total_rows, f_max = build_plan(layer_sizes)
    packed = jnp.zeros((total_rows, f_max), jnp.float32)
    idx = 0
    for e in plan:
        fi, fo = e["fan_in"], e["fan_out"]
        w, b = params[idx], params[idx + 1]
        idx += 2
        if not e["is_hidden"]:
            w = w * OUT_SCALE
            b = b * OUT_SCALE
        if e["mode"] == "reduce":
            packed = packed.at[e["w_off"], :fi].set(w[:, 0])          # store W^T as one row
        else:
            packed = packed.at[e["w_off"]:e["w_off"] + fi, :fo].set(w)
        packed = packed.at[e["b_off"], :fo].set(b)
        if e["is_hidden"]:
            gamma, beta = params[idx], params[idx + 1]
            idx += 2
            packed = packed.at[e["g_off"], :fo].set(gamma)
            packed = packed.at[e["beta_off"], :fo].set(beta)
    return packed


def _make_kernel(plan, s_blk, batch, in_dim):
    """Fused MLP forward for a block of s_blk independent steps; plan baked in statically."""
    rows = s_blk * batch

    def kernel(x_ref, p_ref, out_ref):
        # Fold the step axis into the sublane/row dimension: (s_blk, batch, d) -> (rows, d).
        x = x_ref[...].reshape(rows, in_dim).astype(jnp.float32)
        for e in plan:
            fi, fo = e["fan_in"], e["fan_out"]
            w_off, b_off = e["w_off"], e["b_off"]
            b = p_ref[b_off:b_off + 1, :fo]                           # (1, fo)

            if e["mode"] == "fma":
                # Tiny contraction dim: K broadcast FMAs on the VPU (no MXU padding/latency).
                h = b
                for k in range(fi):
                    h = h + x[:, k:k + 1] * p_ref[w_off + k:w_off + k + 1, :fo]
            elif e["mode"] == "reduce":
                # Scalar head as (1, fi) . (rows, fi)^T on the MXU -> lane-dense (1, rows).
                # The 1/32 scale is already folded into w_row and b at pack time.
                w_row = p_ref[w_off:w_off + 1, :fi]
                h = lax.dot_general(w_row, x, (((1,), (1,)), ((), ())),
                                    preferred_element_type=jnp.float32) + b
            else:
                w = p_ref[w_off:w_off + fi, :fo]                      # (fi, fo), aligned view
                h = jnp.dot(x, w, preferred_element_type=jnp.float32) + b

            if e["is_hidden"]:
                gamma = p_ref[e["g_off"]:e["g_off"] + 1, :fo][None]   # (1, 1, fo)
                beta = p_ref[e["beta_off"]:e["beta_off"] + 1, :fo][None]
                # Segmented BatchNorm1d (training mode): stats per step over its own batch
                # rows only.  Two-pass biased variance (non-negative, no cancellation).
                h3 = h.reshape(s_blk, batch, fo)
                mean = jnp.mean(h3, axis=1, keepdims=True)            # (s_blk, 1, fo)
                var = jnp.mean((h3 - mean) ** 2, axis=1, keepdims=True)
                h3 = (h3 - mean) * lax.rsqrt(var + BN_EPS) * gamma + beta
                # sigmoid(h) == 0.5 * tanh(0.5 h) + 0.5 -> EUP, avoids the VALU divide.
                x = (0.5 * jnp.tanh(0.5 * h3) + 0.5).reshape(rows, fo)
            else:
                x = h
        # x is the lane-dense (1, rows) head output -> single unmasked full-width store.
        out_ref[...] = x.astype(out_ref.dtype)

    return kernel


def _forward_steps_impl(xs, packed_params, layer_sizes, s_blk):
    num_steps, batch, in_dim = xs.shape
    assert in_dim == layer_sizes[0]
    assert layer_sizes[-1] == 1, "HamiltonianNN head must output a scalar H"
    plan, total_rows, f_max = build_plan(layer_sizes)

    s_blk = max(1, min(s_blk, num_steps))
    padded_steps = ((num_steps + s_blk - 1) // s_blk) * s_blk
    if padded_steps != num_steps:
        pad = jnp.zeros((padded_steps - num_steps, batch, in_dim), xs.dtype)
        xs = jnp.concatenate([xs, pad], axis=0)
    num_blocks = padded_steps // s_blk
    rows = s_blk * batch

    out = pl.pallas_call(
        _make_kernel(plan, s_blk, batch, in_dim),
        out_shape=jax.ShapeDtypeStruct((num_blocks, 1, rows), jnp.float32),
        grid=(num_blocks,),
        in_specs=[
            # S_BLK steps of activations per grid iteration.
            pl.BlockSpec((s_blk, batch, in_dim), lambda s: (s, 0, 0)),
            # Packed params: same block every step -> DMA'd once, resident in VMEM.
            pl.BlockSpec((total_rows, f_max), lambda s: (0, 0)),
        ],
        # Lane-dense (1, rows) output block per grid iteration.
        out_specs=pl.BlockSpec((None, 1, rows), lambda s: (s, 0, 0)),
        compiler_params=pltpu.CompilerParams(dimension_semantics=("parallel",)),
    )(xs, packed_params)

    # (num_blocks, 1, s_blk*batch) -> (num_steps, batch, 1): pure layout plumbing in XLA.
    y = out.reshape(padded_steps, batch)[:num_steps]
    return y[..., None]


@functools.partial(jax.jit, static_argnums=(2,))
def hamiltonian_nn_forward_steps(xs, packed_params, layer_sizes):
    """Many independent forward evaluations (e.g. integrator steps) in ONE pallas_call.

    xs: (num_steps, batch, in_dim).  Steps are blocked S_BLK per grid iteration; BatchNorm
    statistics are computed per step over that step's batch, exactly like repeated module
    calls.  This is the fast path — use it for any repeated evaluation."""
    return _forward_steps_impl(xs, packed_params, layer_sizes, S_BLK)


@functools.partial(jax.jit, static_argnums=(2,))
def hamiltonian_nn_forward(x, packed_params, layer_sizes):
    """Single forward pass (debug/reference path; launch-latency dominated by design)."""
    return _forward_steps_impl(x[None], packed_params, layer_sizes, 1)[0]


def reference_forward(x, params, layer_sizes):
    """Pure-JAX reference matching the PyTorch training-mode forward."""
    num_layers = len(layer_sizes) - 1
    h = x.astype(jnp.float32)
    idx = 0
    for _ in range(num_layers - 1):
        w, b, gamma, beta = params[idx], params[idx + 1], params[idx + 2], params[idx + 3]
        idx += 4
        h = h @ w + b
        mean = jnp.mean(h, axis=0, keepdims=True)
        var = jnp.mean((h - mean) ** 2, axis=0, keepdims=True)
        h = (h - mean) / jnp.sqrt(var + BN_EPS) * gamma + beta
        h = jax.nn.sigmoid(h)
    w, b = params[idx], params[idx + 1]
    return (h @ w + b) / 32.0


if __name__ == "__main__":
    # Double-well Hamiltonian NN: input (q, p) -> scalar H.
    layer_sizes = (2, 32, 32, 1)
    batch = 8

    key = jax.random.PRNGKey(0)
    key, kx = jax.random.split(key)
    x = jax.random.normal(kx, (batch, layer_sizes[0]), jnp.float32)

    params = init_params(jax.random.PRNGKey(0), layer_sizes)
    packed = pack_params(params, layer_sizes)

    # Single fused forward (debug/reference path).
    y = hamiltonian_nn_forward(x, packed, layer_sizes)
    y = jax.block_until_ready(y)
    y_ref = reference_forward(x, params, layer_sizes)
    assert y.shape == (batch, 1)
    assert jnp.allclose(y, y_ref, atol=1e-5, rtol=1e-4), (y, y_ref)

    # Many forwards in one pallas_call: step axis blocked by S_BLK, params VMEM-resident.
    num_steps = 37   # deliberately not a multiple of S_BLK: exercises the padding path
    key, ks = jax.random.split(key)
    xs = jax.random.normal(ks, (num_steps, batch, layer_sizes[0]), jnp.float32)
    ys = hamiltonian_nn_forward_steps(xs, packed, layer_sizes)
    ys = jax.block_until_ready(ys)
    ys_ref = jnp.stack([reference_forward(xs[i], params, layer_sizes)
                        for i in range(num_steps)])
    assert ys.shape == (num_steps, batch, 1)
    assert jnp.allclose(ys, ys_ref, atol=1e-5, rtol=1e-4), float(jnp.abs(ys - ys_ref).max())

    print("KERNEL_OK")
</pallas_src>

<mosaic_0001>
module attributes {stable_mosaic.version = 11 : i64} {
  func.func @kernel(%arg0: i32, %arg1: memref<1x8x2xf32, #tpu.memory_space<vmem>>, %arg2: memref<50x32xf32, #tpu.memory_space<vmem>>, %arg3: memref<1x1x8xf32, #tpu.memory_space<vmem>>) attributes {dimension_semantics = [#tpu.dimension_semantics<parallel>], iteration_bounds = array<i64: 1>, scalar_prefetch = 0 : i64, scratch_operands = 0 : i64, tpu.core_type = #tpu.core_type<tc>, window_params = [{transform_indices = @transform_0, window_bounds = array<i64: 1, 8, 2>}, {pipeline_mode = #tpu.pipeline_mode<synchronous>, transform_indices = @transform_1, window_bounds = array<i64: 50, 32>}, {transform_indices = @transform_2, window_bounds = array<i64: 1, 1, 8>}]} {
    %c0 = arith.constant 0 : index
    %c0_0 = arith.constant 0 : index
    %c0_1 = arith.constant 0 : index
    %0 = vector.load %arg1[%c0, %c0_0, %c0_1] : memref<1x8x2xf32, #tpu.memory_space<vmem>>, vector<1x8x2xf32>
    %1 = vector.shape_cast %0 : vector<1x8x2xf32> to vector<8x2xf32>
    %c2 = arith.constant 2 : index
    %c0_2 = arith.constant 0 : index
    %2 = vector.load %arg2[%c2, %c0_2] : memref<50x32xf32, #tpu.memory_space<vmem>>, vector<1x32xf32>
    %3 = vector.extract_strided_slice %1 {offsets = [0, 0], sizes = [8, 1], strides = [1, 1]} : vector<8x2xf32> to vector<8x1xf32>
    %c0_3 = arith.constant 0 : index
    %c0_4 = arith.constant 0 : index
    %4 = vector.load %arg2[%c0_3, %c0_4] : memref<50x32xf32, #tpu.memory_space<vmem>>, vector<1x32xf32>
    %5 = vector.broadcast %3 : vector<8x1xf32> to vector<8x32xf32>
    %6 = vector.broadcast %4 : vector<1x32xf32> to vector<8x32xf32>
    %7 = arith.mulf %5, %6 : vector<8x32xf32>
    %8 = vector.broadcast %2 : vector<1x32xf32> to vector<8x32xf32>
    %9 = arith.addf %8, %7 : vector<8x32xf32>
    %10 = vector.extract_strided_slice %1 {offsets = [0, 1], sizes = [8, 1], strides = [1, 1]} : vector<8x2xf32> to vector<8x1xf32>
    %c1 = arith.constant 1 : index
    %c0_5 = arith.constant 0 : index
    %11 = vector.load %arg2[%c1, %c0_5] : memref<50x32xf32, #tpu.memory_space<vmem>>, vector<1x32xf32>
    %12 = vector.broadcast %10 : vector<8x1xf32> to vector<8x32xf32>
    %13 = vector.broadcast %11 : vector<1x32xf32> to vector<8x32xf32>
    %14 = arith.mulf %12, %13 : vector<8x32xf32>
    %15 = arith.addf %9, %14 : vector<8x32xf32>
    %c3 = arith.constant 3 : index
    %c0_6 = arith.constant 0 : index
    %16 = vector.load %arg2[%c3, %c0_6] : memref<50x32xf32, #tpu.memory_space<vmem>>, vector<1x32xf32>
    %17 = vector.shape_cast %16 : vector<1x32xf32> to vector<1x1x32xf32>
    %c4 = arith.constant 4 : index
    %c0_7 = arith.constant 0 : index
    %18 = vector.load %arg2[%c4, %c0_7] : memref<50x32xf32, #tpu.memory_space<vmem>>, vector<1x32xf32>
    %19 = vector.shape_cast %18 : vector<1x32xf32> to vector<1x1x32xf32>
    %20 = vector.shape_cast %15 : vector<8x32xf32> to vector<1x8x32xf32>
    %cst = arith.constant dense<0.000000e+00> : vector<1x32xf32>
    %21 = vector.multi_reduction <add>, %20, %cst [1] : vector<1x8x32xf32> to vector<1x32xf32>
    %22 = vector.shape_cast %21 : vector<1x32xf32> to vector<1x1x32xf32>
    %cst_8 = arith.constant 8.000000e+00 : f32
    %23 = vector.broadcast %cst_8 : f32 to vector<1x1x32xf32>
    %24 = arith.divf %22, %23 : vector<1x1x32xf32>
    %25 = vector.broadcast %24 : vector<1x1x32xf32> to vector<1x8x32xf32>
    %26 = arith.subf %20, %25 : vector<1x8x32xf32>
    %27 = arith.mulf %26, %26 : vector<1x8x32xf32>
    %cst_9 = arith.constant dense<0.000000e+00> : vector<1x32xf32>
    %28 = vector.multi_reduction <add>, %27, %cst_9 [1] : vector<1x8x32xf32> to vector<1x32xf32>
    %29 = vector.shape_cast %28 : vector<1x32xf32> to vector<1x1x32xf32>
    %cst_10 = arith.constant 8.000000e+00 : f32
    %30 = vector.broadcast %cst_10 : f32 to vector<1x1x32xf32>
    %31 = arith.divf %29, %30 : vector<1x1x32xf32>
    %32 = vector.broadcast %24 : vector<1x1x32xf32> to vector<1x8x32xf32>
    %33 = arith.subf %20, %32 : vector<1x8x32xf32>
    %cst_11 = arith.constant 9.99999974E-6 : f32
    %34 = vector.broadcast %cst_11 : f32 to vector<1x1x32xf32>
    %35 = arith.addf %31, %34 : vector<1x1x32xf32>
    %36 = math.rsqrt %35 : vector<1x1x32xf32>
    %37 = vector.broadcast %36 : vector<1x1x32xf32> to vector<1x8x32xf32>
    %38 = arith.mulf %33, %37 : vector<1x8x32xf32>
    %39 = vector.broadcast %17 : vector<1x1x32xf32> to vector<1x8x32xf32>
    %40 = arith.mulf %38, %39 : vector<1x8x32xf32>
    %41 = vector.broadcast %19 : vector<1x1x32xf32> to vector<1x8x32xf32>
    %42 = arith.addf %40, %41 : vector<1x8x32xf32>
    %cst_12 = arith.constant 5.000000e-01 : f32
    %43 = vector.broadcast %cst_12 : f32 to vector<1x8x32xf32>
    %44 = arith.mulf %43, %42 : vector<1x8x32xf32>
    %45 = math.tanh %44 : vector<1x8x32xf32>
    %cst_13 = arith.constant 5.000000e-01 : f32
    %46 = vector.broadcast %cst_13 : f32 to vector<1x8x32xf32>
    %47 = arith.mulf %46, %45 : vector<1x8x32xf32>
    %cst_14 = arith.constant 5.000000e-01 : f32
    %48 = vector.broadcast %cst_14 : f32 to vector<1x8x32xf32>
    %49 = arith.addf %47, %48 : vector<1x8x32xf32>
    %50 = vector.shape_cast %49 : vector<1x8x32xf32> to vector<8x32xf32>
    %c40 = arith.constant 40 : index
    %c0_15 = arith.constant 0 : index
    %51 = vector.load %arg2[%c40, %c0_15] : memref<50x32xf32, #tpu.memory_space<vmem>>, vector<1x32xf32>
    %c8 = arith.constant 8 : index
    %c0_16 = arith.constant 0 : index
    %52 = vector.load %arg2[%c8, %c0_16] : memref<50x32xf32, #tpu.memory_space<vmem>>, vector<32x32xf32>
    %cst_17 = arith.constant dense<0.000000e+00> : vector<8x32xf32>
    %53 = tpu.matmul %50, %52, %cst_17 {dimension_numbers = #tpu.dot_dimension_numbers<[1], [0], [0], [1], [0, 0, 1, 1], [], []>} : vector<8x32xf32>, vector<32x32xf32>, vector<8x32xf32> -> vector<8x32xf32>
    %54 = vector.broadcast %51 : vector<1x32xf32> to vector<8x32xf32>
    %55 = arith.addf %53, %54 : vector<8x32xf32>
    %c41 = arith.constant 41 : index
    %c0_18 = arith.constant 0 : index
    %56 = vector.load %arg2[%c41, %c0_18] : memref<50x32xf32, #tpu.memory_space<vmem>>, vector<1x32xf32>
    %57 = vector.shape_cast %56 : vector<1x32xf32> to vector<1x1x32xf32>
    %c42 = arith.constant 42 : index
    %c0_19 = arith.constant 0 : index
    %58 = vector.load %arg2[%c42, %c0_19] : memref<50x32xf32, #tpu.memory_space<vmem>>, vector<1x32xf32>
    %59 = vector.shape_cast %58 : vector<1x32xf32> to vector<1x1x32xf32>
    %60 = vector.shape_cast %55 : vector<8x32xf32> to vector<1x8x32xf32>
    %cst_20 = arith.constant dense<0.000000e+00> : vector<1x32xf32>
    %61 = vector.multi_reduction <add>, %60, %cst_20 [1] : vector<1x8x32xf32> to vector<1x32xf32>
    %62 = vector.shape_cast %61 : vector<1x32xf32> to vector<1x1x32xf32>
    %cst_21 = arith.constant 8.000000e+00 : f32
    %63 = vector.broadcast %cst_21 : f32 to vector<1x1x32xf32>
    %64 = arith.divf %62, %63 : vector<1x1x32xf32>
    %65 = vector.broadcast %64 : vector<1x1x32xf32> to vector<1x8x32xf32>
    %66 = arith.subf %60, %65 : vector<1x8x32xf32>
    %67 = arith.mulf %66, %66 : vector<1x8x32xf32>
    %cst_22 = arith.constant dense<0.000000e+00> : vector<1x32xf32>
    %68 = vector.multi_reduction <add>, %67, %cst_22 [1] : vector<1x8x32xf32> to vector<1x32xf32>
    %69 = vector.shape_cast %68 : vector<1x32xf32> to vector<1x1x32xf32>
    %cst_23 = arith.constant 8.000000e+00 : f32
    %70 = vector.broadcast %cst_23 : f32 to vector<1x1x32xf32>
    %71 = arith.divf %69, %70 : vector<1x1x32xf32>
    %72 = vector.broadcast %64 : vector<1x1x32xf32> to vector<1x8x32xf32>
    %73 = arith.subf %60, %72 : vector<1x8x32xf32>
    %cst_24 = arith.constant 9.99999974E-6 : f32
    %74 = vector.broadcast %cst_24 : f32 to vector<1x1x32xf32>
    %75 = arith.addf %71, %74 : vector<1x1x32xf32>
    %76 = math.rsqrt %75 : vector<1x1x32xf32>
    %77 = vector.broadcast %76 : vector<1x1x32xf32> to vector<1x8x32xf32>
    %78 = arith.mulf %73, %77 : vector<1x8x32xf32>
    %79 = vector.broadcast %57 : vector<1x1x32xf32> to vector<1x8x32xf32>
    %80 = arith.mulf %78, %79 : vector<1x8x32xf32>
    %81 = vector.broadcast %59 : vector<1x1x32xf32> to vector<1x8x32xf32>
    %82 = arith.addf %80, %81 : vector<1x8x32xf32>
    %cst_25 = arith.constant 5.000000e-01 : f32
    %83 = vector.broadcast %cst_25 : f32 to vector<1x8x32xf32>
    %84 = arith.mulf %83, %82 : vector<1x8x32xf32>
    %85 = math.tanh %84 : vector<1x8x32xf32>
    %cst_26 = arith.constant 5.000000e-01 : f32
    %86 = vector.broadcast %cst_26 : f32 to vector<1x8x32xf32>
    %87 = arith.mulf %86, %85 : vector<1x8x32xf32>
    %cst_27 = arith.constant 5.000000e-01 : f32
    %88 = vector.broadcast %cst_27 : f32 to vector<1x8x32xf32>
    %89 = arith.addf %87, %88 : vector<1x8x32xf32>
    %90 = vector.shape_cast %89 : vector<1x8x32xf32> to vector<8x32xf32>
    %c49 = arith.constant 49 : index
    %c0_28 = arith.constant 0 : index
    %91 = vector.load %arg2[%c49, %c0_28] : memref<50x32xf32, #tpu.memory_space<vmem>>, vector<1x1xf32>
    %c48 = arith.constant 48 : index
    %c0_29 = arith.constant 0 : index
    %92 = vector.load %arg2[%c48, %c0_29] : memref<50x32xf32, #tpu.memory_space<vmem>>, vector<1x32xf32>
    %cst_30 = arith.constant dense<0.000000e+00> : vector<1x8xf32>
    %93 = tpu.matmul %92, %90, %cst_30 {dimension_numbers = #tpu.dot_dimension_numbers<[1], [1], [0], [0], [0, 0, 1, 0], [], []>} : vector<1x32xf32>, vector<8x32xf32>, vector<1x8xf32> -> vector<1x8xf32>
    %94 = vector.broadcast %91 : vector<1x1xf32> to vector<1x8xf32>
    %95 = arith.addf %93, %94 : vector<1x8xf32>
    %c0_31 = arith.constant 0 : index
    %c0_32 = arith.constant 0 : index
    %c0_33 = arith.constant 0 : index
    %96 = vector.load %arg3[%c0_31, %c0_32, %c0_33] : memref<1x1x8xf32, #tpu.memory_space<vmem>>, vector<1x1x8xf32>
    %97 = vector.shape_cast %96 : vector<1x1x8xf32> to vector<1x8xf32>
    %98 = vector.shape_cast %95 : vector<1x8xf32> to vector<1x1x8xf32>
    tpu.vector_store %arg3[%c0_31, %c0_32, %c0_33], %98 {strides = array<i32>} : memref<1x1x8xf32, #tpu.memory_space<vmem>>, vector<1x1x8xf32>,
    return
  }
  func.func @transform_0(%arg0: i32) -> (i32, i32, i32) {
    %c0_i32 = arith.constant 0 : i32
    %c0_i32_0 = arith.constant 0 : i32
    %c0_i32_1 = arith.constant 0 : i32
    return %arg0, %c0_i32, %c0_i32_0 : i32, i32, i32
  }
  func.func @transform_1(%arg0: i32) -> (i32, i32) {
    %c0_i32 = arith.constant 0 : i32
    %c0_i32_0 = arith.constant 0 : i32
    %c0_i32_1 = arith.constant 0 : i32
    return %c0_i32, %c0_i32_0 : i32, i32
  }
  func.func @transform_2(%arg0: i32) -> (i32, i32, i32) {
    %c0_i32 = arith.constant 0 : i32
    %c0_i32_0 = arith.constant 0 : i32
    %c0_i32_1 = arith.constant 0 : i32
    return %arg0, %c0_i32, %c0_i32_0 : i32, i32, i32
  }
}

</mosaic_0001>

<bundles_post_ra>
// kernel: hamiltonian_nn_forward.1
= control target key start
LH: loop header
LB: loop body
LE: loop exit
PB: predicated region body
PF: predicated region fallthrough
CT: control target
= control target key end

     0   :  { %v380_v1 = vmov 0   ;;  %s465_s0 = inlined_call_operand.vmem [shape: f32[1,8,2], index: 0, kind: input, shape index: {}]   ;;  %s466_s1 = inlined_call_operand.vmem [shape: f32[50,32], index: 1, kind: input, shape index: {}]   ;;  %s467_s2 = inlined_call_operand.hbm [shape: f32[1,1,8], index: 2, kind: output, shape index: {}]  }
   0x1   :  { %v12_v0 = vld [vmem:[%s465_s0] sm:$0xff]  ;;  %344 = vset.pattern.permute.xlu0 %v380_v1  ;;  %346 = vset.pattern.permute.xlu1 %v380_v1 }
   0x2   :  { %7 = vsyncpa [#allocation3], 0  ;;  %17 = vperm.xlu0 %344, %v12_v0   ;;  %v381_v2 = vmov 1   ;;  %v81_v3 = vld [vmem:[%s466_s1 + $0x8] sm:$0xff]  ;;  %v82_v4 = vld [vmem:[%s466_s1 + $0x10] sm:$0xff]  ;;  %v382_v6 = vmov 0.0|0.0  }
   0x3   :  { %v83_v5 = vld [vmem:[%s466_s1 + $0x18] sm:$0xff]  ;;  %332 = vmatprep.subr.bf16.mxu0 %v382_v6  ;;  %v333_v7 = vpack.c.bf16 %v82_v4, %v81_v3  ;;  %v84_v8 = vld [vmem:[%s466_s1 + $0x20] sm:$0xff]  ;;  %vm383_vm0 = vmmov 0   ;;  %v384_v9 = vmov 0.0   ;;  %vm43_vm1 = vcmask 261120   ;;  %s385_s10 = smov [#allocation2]  }
   0x4   :  { %324 = vmatprep.mubr.msk.f32.mxu0 %vm383_vm0, %v384_v9  ;;  %327 = vmatprep.subr.mxu1 %v384_v9  ;;  %v336_v10 = vpack.c.bf16 %v84_v8, %v83_v5  ;;  %v298_v11 = vld [vmem:[%s466_s1] ss:$0 sm:$0xff]  ;;  %v299_v14 = vld [vmem:[%s466_s1 + $0x2] ss:$0 sm:$0xff]  ;;  %v300_v15 = vld [vmem:[%s466_s1 + $0x1] ss:$0 sm:$0xff] }
   0x5   :  { %329 = vmatprep.mubr.msk.f32.mxu1 %vm383_vm0, %v384_v9  ;;  %334 = vmatpush3.bf16.msra.mxu0 %v333_v7  ;;  %v301_v40 = vld [vmem:[%s466_s1 + $0x3] ss:$0 sm:$0xff]  ;;  %v302_v42 = vld [vmem:[%s466_s1 + $0x4] ss:$0 sm:$0xff]  ;;  %v199_v49 = vld [vmem:[%s466_s1 + $0x31] sm:$0x1] }
   0x6   :  { %345 = vset.pattern.permute.xlu0 %v381_v2  ;;  %335 = vmatprep.subr.bf16.mxu0 %v382_v6  ;;  %v303_v50 = vld [vmem:[%s466_s1 + $0x28] ss:$0 sm:$0xff]  ;;  %s290_s11 = sshll.u32 %s385_s10, 4  ;;  %vm282_vm2 = vcmask 57344   ;;  %s291_s11 = int_to_ptr.vmem [resolvable:$true] %s290_s11 }
   0x7   :  { %32 = vperm.xlu0 %345, %v12_v0   ;;  %203 = vperm.xlu1 %346, %v199_v49   ;;  %s356_s12 = scalar_lea.vmem %s291_s11, 16  ;;  %s360_s13 = scalar_lea.vmem %s291_s11, 32 }
   0x8   :  { %p357_p0 = scmp.ne.s32.totalorder %s291_s11, %s356_s12  ;;  %p361_p1 = scmp.lt.s32.totalorder %s291_s11, %s291_s11 }
   0x9   :  { %337 = vmatpush3.bf16.msra.mxu0 %v336_v10  ;;  %v305_v10 = vld [vmem:[%s466_s1 + $0x29] ss:$0 sm:$0xff]  ;;  %p362_p2 = scmp.lt.s32.totalorder %s360_s13, %s356_s12 }
   0xb   :  { %347 = vset.pattern.permute.xlu0 %v380_v1  ;;  %p363_p3 = por %p362_p2, %p361_p1 }
   0xd   :  { %p364_p4 = pnand %p363_p3, %p357_p0 }
  0x81   :  { %v18_v12 = vpop.permute.xlu0 %17 }
  0x82   :  { %v24_v13 = vmul.f32 %v298_v11, %v18_v12  ;;  %v306_v12 = vld [vmem:[%s466_s1 + $0x2a] ss:$0 sm:$0xff] }
  0x84   :  { %v29_v17 = vadd.f32 %v299_v14, %v24_v13 }
  0x86   :  { %v33_v16 = vpop.permute.xlu0 %32 }
  0x87   :  { %v39_v18 = vmul.f32 %v300_v15, %v33_v16 }
  0x89   :  { %v40_v19 = vadd.f32 %v39_v18, %v29_v17 }
  0x8b   :  { %v44_v20 = vsel %vm43_vm1, %v40_v19, 0.0 }
  0x8c   :  { %v45_v21 = vrot.slane %v44_v20, 4 }
  0x8e   :  { %v46_v22 = vadd.f32 %v45_v21, %v44_v20  ;;  %v204_v20 = vpop.permute.xlu1 %203 }
  0x90   :  { %v47_v23 = vrot.slane %v46_v22, 2 }
  0x92   :  { %v48_v24 = vadd.f32 %v47_v23, %v46_v22 }
  0x94   :  { %v49_v25 = vrot.slane %v48_v24, 1 }
  0x96   :  { %v50_v26 = vadd.f32 %v49_v25, %v48_v24 }
  0x98   :  { %v52_v27 = vmul.f32 0.125, %v50_v26 }
  0x9a   :  { %v53_v28 = vsub.f32 %v40_v19, %v52_v27  ;;  %v200_v19 = vld [vmem:[%s466_s1 + $0x30] sm:$0x1] }
  0x9c   :  { %v54_v29 = vmul.f32 %v53_v28, %v53_v28 }
  0x9e   :  { %v55_v30 = vsel %vm43_vm1, %v54_v29, 0.0 }
  0x9f   :  { %v56_v31 = vrot.slane %v55_v30, 4 }
  0xa1   :  { %v57_v32 = vadd.f32 %v56_v31, %v55_v30 }
  0xa3   :  { %v58_v33 = vrot.slane %v57_v32, 2 }
  0xa5   :  { %v59_v34 = vadd.f32 %v58_v33, %v57_v32 }
  0xa7   :  { %v60_v35 = vrot.slane %v59_v34, 1 }
  0xa9   :  { %v61_v36 = vadd.f32 %v60_v35, %v59_v34 }
  0xab   :  { %v62_v37 = vmul.f32 0.125, %v61_v36 }
  0xad   :  { %v63_v38 = vadd.f32 1e-05, %v62_v37 }
  0xaf   :  { %348 = vrsqrt.f32 %v63_v38 }
  0xb9   :  { %v349_v39 = vpop.eup %348 }
  0xba   :  { %v65_v41 = vmul.f32 %v349_v39, %v53_v28 }
  0xbc   :  { %v70_v43 = vmul.f32 %v301_v40, %v65_v41 }
  0xbe   :  { %v75_v44 = vadd.f32 %v302_v42, %v70_v43 }
  0xc0   :  { %v76_v45 = vmul.f32 0.5, %v75_v44 }
  0xc2   :  { %350 = vtanh.f32 %v76_v45 }
  0xcc   :  { %v351_v46 = vpop.eup %350 }
  0xcd   :  { %v78_v47 = vmul.f32 0.5, %v351_v46 }
  0xcf   :  { %v79_v48 = vadd.f32 0.5, %v78_v47 }
  0xd1   :  { %325 = vmatmul.mubr.msk.f32.vlgmr.msra.gmra.mrb[0].mxu0 %vm43_vm1, %v79_v48 }
 0x1a4   :  { %v158_v51 = vpop.f32.mrb[0].mxu0 }
 0x1a5   :  { %v159_v52 = vadd.f32 %v303_v50, %v158_v51  ;;  %v326_v53 = vpop.f32.mrb[1].mxu0 }
 0x1a7   :  { %v164_v54 = vsel %vm43_vm1, %v159_v52, 0.0 }
 0x1a8   :  { %v165_v55 = vrot.slane %v164_v54, 4 }
 0x1aa   :  { %v166_v56 = vadd.f32 %v165_v55, %v164_v54 }
 0x1ac   :  { %v167_v57 = vrot.slane %v166_v56, 2 }
 0x1ae   :  { %v168_v58 = vadd.f32 %v167_v57, %v166_v56 }
 0x1b0   :  { %v169_v59 = vrot.slane %v168_v58, 1 }
 0x1b2   :  { %v170_v60 = vadd.f32 %v169_v59, %v168_v58 }
 0x1b4   :  { %v171_v61 = vmul.f32 0.125, %v170_v60 }
 0x1b6   :  { %v172_v62 = vsub.f32 %v159_v52, %v171_v61 }
 0x1b8   :  { %v173_v63 = vmul.f32 %v172_v62, %v172_v62 }
 0x1ba   :  { %v174_v0 = vsel %vm43_vm1, %v173_v63, 0.0 }
 0x1bb   :  { %v175_v1 = vrot.slane %v174_v0, 4 }
 0x1bd   :  { %v176_v2 = vadd.f32 %v175_v1, %v174_v0 }
 0x1bf   :  { %v177_v3 = vrot.slane %v176_v2, 2 }
 0x1c1   :  { %v178_v4 = vadd.f32 %v177_v3, %v176_v2 }
 0x1c3   :  { %v179_v5 = vrot.slane %v178_v4, 1 }
 0x1c5   :  { %v180_v6 = vadd.f32 %v179_v5, %v178_v4 }
 0x1c7   :  { %v181_v7 = vmul.f32 0.125, %v180_v6 }
 0x1c9   :  { %v182_v8 = vadd.f32 1e-05, %v181_v7 }
 0x1cb   :  { %352 = vrsqrt.f32 %v182_v8 }
 0x1d5   :  { %v353_v9 = vpop.eup %352 }
 0x1d6   :  { %v184_v11 = vmul.f32 %v353_v9, %v172_v62 }
 0x1d8   :  { %v189_v13 = vmul.f32 %v305_v10, %v184_v11 }
 0x1da   :  { %v194_v14 = vadd.f32 %v306_v12, %v189_v13 }
 0x1dc   :  { %v195_v15 = vmul.f32 0.5, %v194_v14 }
 0x1de   :  { %354 = vtanh.f32 %v195_v15 }
 0x1e8   :  { %v355_v16 = vpop.eup %354 }
 0x1e9   :  { %v197_v17 = vmul.f32 0.5, %v355_v16 }
 0x1eb   :  { %v198_v18 = vadd.f32 0.5, %v197_v17 }
 0x1ed   :  { %328 = vmatpush3.xpose.msk.msra.mxu1 %vm43_vm1, %v198_v18 }
 0x1f0   :  { %330 = vmatmul.mubr.msk.f32.vlgmr.msra.gmra.mrb[0].mxu1 %vm43_vm1, %v200_v19 }
 0x2c3   :  { %v278_v21 = vpop.f32.mrb[0].mxu1 }
 0x2c4   :  { %v279_v22 = vadd.f32 %v278_v21, %v204_v20  ;;  %v331_v23 = vpop.f32.mrb[1].mxu1 }
 0x2c6   :  { %283 = vst.msk [vmem:[#allocation2] sm:$0x1] %vm282_vm2, %v279_v22 }
 0x2c7   :  { %367 = shalt.err (!%p364_p4)
}
 0x2c8   :  { %s368_s15 = scalar_lea.hbm %s467_s2, 16 }
 0x2c9   :  { %p369_p5 = scmp.ne.s32.totalorder %s467_s2, %s368_s15  ;;  %p372_p6 = scmp.lt.u32.totalorder %s368_s15, %s467_s2 }
 0x2cb   :  { %p374_p7 = pnand %p372_p6, %p369_p5 }
 0x2cd   :  { %377 = shalt.err (!%p374_p7)
}
 0x2ce   :  { %293 = dma.vmem_to_hbm [thread:$0]  %s291_s11, 16, %s467_s2, [#allocation3]  }
 0x2cf   :  { %378 = dma.done.wait [#allocation3], 16  }
 0x2d0   :  { %379 = vsyncadd [#allocation3], 4294967280 }
 0x2d1   :  { %297 = vsyncpa [#allocation3], 1 }

</bundles_post_ra>
